<compile_context>
chip_gen: v6e
topology: v6e:2x2x1
jax: 0.10.0
libtpu: 0.0.40
codegen_flags: <defaults>
</compile_context>

<pallas_src>
import functools

import jax
import jax.numpy as jnp
from jax.experimental import pallas as pl
from jax.experimental.pallas import tpu as pltpu

_EPS = 1e-5      # PyTorch BatchNorm1d default eps
_LANES = 128     # TPU vreg lane width


# --------------------------------------------------------------------------- #
# VMEM budget / tile selection
# --------------------------------------------------------------------------- #
def _vmem_limit_bytes():
    """Scoped-VMEM request derived from the running chip (64 MiB v7x, 128 MiB v5e/v6e)."""
    try:
        cap = int(pltpu.get_tpu_info().vmem_capacity_bytes)
    except Exception:  # conservative fallback (v7x per-core figure)
        cap = 64 * 1024 * 1024
    return int(min(cap * 3 // 4, 112 * 1024 * 1024))


def _pick_tile_rows(N, B, x_dim, vmem_limit):
    """Largest row tile (multiple of 128, dividing N) whose double-buffered A block
    plus resident scratch fits the VMEM budget; small/irregular N -> one full block."""
    if N <= 256 or N % 128 != 0:
        return N
    fixed = (N * _LANES * 2        # XW scratch (bf16)
             + N * x_dim * 2       # resident X block (bf16)
             + 8 * _LANES * 4      # packed param slab
             + B * _LANES * 4)     # resident partial-G output block
    budget = max(vmem_limit - fixed - (4 << 20), 1 << 20)
    per_row = 2 * (N * 2 + B * 4)  # double-buffered bf16 A row + f32 pool column
    tm = max(128, (budget // per_row // 128) * 128)
    tm = min(tm, N)
    while N % tm != 0:             # terminates at 128 since N % 128 == 0
        tm -= 128
    return tm


# --------------------------------------------------------------------------- #
# Phase 1: streamed embedding + accumulated mean pool (HBM-bound stage)
# --------------------------------------------------------------------------- #
def _graph_pool_kernel(x_ref, a_ref, p_ref, we_ref, prm_ref, gpart_ref, xw_ref):
    f32, bf16 = jnp.float32, jnp.bfloat16
    t = pl.program_id(1)   # reduction (row-tile) axis, marked "arbitrary"

    @pl.when(t == 0)
    def _():
        # XW = X @ W_emb computed once per parallel slice; zero this slice's G.
        xw = jnp.dot(x_ref[...], we_ref[...], preferred_element_type=f32)
        xw_ref[...] = xw.astype(bf16)
        gpart_ref[...] = jnp.zeros_like(gpart_ref)

    # H_tile = ReLU(A[tile, :] @ XW + b_emb)   (padded lanes stay exactly 0)
    h = jnp.maximum(
        jnp.dot(a_ref[...], xw_ref[...], preferred_element_type=f32)
        + prm_ref[0:1, :], 0.0)                                            # [tm, 128]

    # G_slice += P[:, tile] @ H_tile    (mean pool, accumulated in f32)
    gpart_ref[...] += jnp.dot(p_ref[...].astype(bf16), h.astype(bf16),
                              preferred_element_type=f32)                  # [B, 128]


# --------------------------------------------------------------------------- #
# Phase 2: fused mu/var heads  (Linear + BatchNorm + ReLU, Sigmoid on var half)
# --------------------------------------------------------------------------- #
def _encoder_head_kernel(gpart_ref, y_ref, wall_ref, prm_ref, out_ref, *, z_dim):
    f32, bf16 = jnp.float32, jnp.bfloat16
    g = jnp.sum(gpart_ref[...], axis=0)                                    # [B, 128]

    # Linear(cat([G, y])) for BOTH heads in one 128-lane matmul:
    #   lanes [0, z)  -> encoder_mean     lanes [z, 2z) -> encoder_var
    lin = (jnp.dot(g.astype(bf16), wall_ref[...], preferred_element_type=f32)
           + y_ref[...] * prm_ref[1:2, :]     # y * [w_mu_y | w_var_y]
           + prm_ref[2:3, :])                 #     [b_mu   | b_var  ]       [B, 128]

    # BatchNorm1d (training mode, biased batch variance) + ReLU, f32 math.
    # Padded lanes stay 0 by construction (zero weights / gamma / beta).
    mean = jnp.mean(lin, axis=0, keepdims=True)
    var = jnp.mean((lin - mean) ** 2, axis=0, keepdims=True)
    bn = ((lin - mean) * jax.lax.rsqrt(var + _EPS) * prm_ref[3:4, :]
          + prm_ref[4:5, :])
    act = jnp.maximum(bn, 0.0)

    # Exact sigmoid only on the var half (lanes >= z_dim); one vreg of work.
    sig = 1.0 / (1.0 + jnp.exp(-act))
    lane = jax.lax.broadcasted_iota(jnp.int32, act.shape, 1)
    out_ref[...] = jnp.where(lane >= z_dim, sig, act)                      # [B, 128]


# --------------------------------------------------------------------------- #
# Wrapper
# --------------------------------------------------------------------------- #
def graph_encoder(x, a, pool, y, params, *, tile_rows=None, num_parallel=None):
    """Fused GraphEncoder forward. `a` should already be stored in bf16.
    Returns (z_mu, z_logvar)."""
    N, x_dim = x.shape
    B = pool.shape[0]
    h_dim = params["w_emb"].shape[1]
    z_dim = params["w_mu_h"].shape[1]
    assert h_dim <= _LANES and 2 * z_dim <= _LANES, "padding assumes <= 128 lanes"
    assert B > 1, "training-mode BatchNorm1d needs batch > 1 (PyTorch raises too)"

    bf16, f32 = jnp.bfloat16, jnp.float32
    vlim = _vmem_limit_bytes()

    # ---- tiling / parallel-slice selection -----------------------------------
    if tile_rows is None:
        tile_rows = _pick_tile_rows(N, B, x_dim, vlim)
    if N % tile_rows != 0 or not (tile_rows % 128 == 0 or tile_rows == N):
        tile_rows = N
    n_tiles = N // tile_rows
    if num_parallel is None:
        num_parallel = 2 if (n_tiles >= 2 and n_tiles % 2 == 0) else 1
    assert n_tiles % num_parallel == 0
    tiles_per_par = n_tiles // num_parallel

    # ---- operands -------------------------------------------------------------
    def pad2(v, shape, dtype):
        out = jnp.zeros(shape, dtype)
        return out.at[: v.shape[0], : v.shape[1]].set(v.astype(dtype))

    x_bf = x.astype(bf16)
    a_bf = a if a.dtype == bf16 else a.astype(bf16)   # ideally already stored bf16
    pool_f = pool.astype(f32)                         # stays f32 (sublane packing)
    we_pad = pad2(params["w_emb"], (x_dim, _LANES), bf16)
    w_all = jnp.concatenate([params["w_mu_h"], params["w_var_h"]], axis=1)
    wall_pad = pad2(w_all, (_LANES, _LANES), bf16)

    # One packed (8, 128) f32 slab for every tiny per-feature parameter:
    #   row 0: b_emb                      row 1: [w_mu_y   | w_var_y  ]
    #   row 2: [b_mu | b_var]             row 3: [gamma_mu | gamma_var]
    #   row 4: [beta_mu | beta_var]       rows 5-7: zero
    def cat2(ka, kb):
        return jnp.concatenate([params[ka], params[kb]], axis=1).reshape(-1)

    prm = jnp.zeros((8, _LANES), f32)
    prm = prm.at[0, :h_dim].set(params["b_emb"].reshape(-1))
    prm = prm.at[1, : 2 * z_dim].set(cat2("w_mu_y", "w_var_y"))
    prm = prm.at[2, : 2 * z_dim].set(cat2("b_mu", "b_var"))
    prm = prm.at[3, : 2 * z_dim].set(cat2("gamma_mu", "gamma_var"))
    prm = prm.at[4, : 2 * z_dim].set(cat2("beta_mu", "beta_var"))

    # ---- phase 1: streamed A row tiles -> partial pooled embeddings ------------
    fixed_map = lambda p_, t_: (0, 0)
    a_map = lambda p_, t_: (p_ * tiles_per_par + t_, 0)
    pool_map = lambda p_, t_: (0, p_ * tiles_per_par + t_)

    flops1 = 2 * (num_parallel * N * x_dim * _LANES + N * N * _LANES + B * N * _LANES)
    bytes1 = (int(a_bf.size) * 2 + int(x_bf.size) * 2 + int(pool_f.size) * 4
              + int(we_pad.size) * 2 + int(prm.size) * 4
              + num_parallel * B * _LANES * 4)

    g_part = pl.pallas_call(
        _graph_pool_kernel,
        out_shape=jax.ShapeDtypeStruct((num_parallel, B, _LANES), f32),
        grid=(num_parallel, tiles_per_par),
        in_specs=[
            pl.BlockSpec((N, x_dim), fixed_map),           # X (resident)
            pl.BlockSpec((tile_rows, N), a_map),           # A row tile (streamed)
            pl.BlockSpec((B, tile_rows), pool_map),        # pool column tile
            pl.BlockSpec((x_dim, _LANES), fixed_map),      # W_emb (resident)
            pl.BlockSpec((8, _LANES), fixed_map),          # packed params (resident)
        ],
        out_specs=pl.BlockSpec((None, B, _LANES), lambda p_, t_: (p_, 0, 0)),
        scratch_shapes=[pltpu.VMEM((N, _LANES), bf16)],    # XW scratch
        compiler_params=pltpu.CompilerParams(
            dimension_semantics=("parallel", "arbitrary"),
            vmem_limit_bytes=vlim),
        cost_estimate=pl.CostEstimate(flops=flops1, transcendentals=0,
                                      bytes_accessed=bytes1),
    )(x_bf, a_bf, pool_f, we_pad, prm)

    # ---- phase 2: sum partials + fused heads (tiny, single invocation) ---------
    vmem = pl.BlockSpec(memory_space=pltpu.MemorySpace.VMEM)
    bytes2 = ((num_parallel + 2) * B * _LANES * 4
              + _LANES * _LANES * 2 + 8 * _LANES * 4 + B * 4)
    out = pl.pallas_call(
        functools.partial(_encoder_head_kernel, z_dim=z_dim),
        out_shape=jax.ShapeDtypeStruct((B, _LANES), f32),
        in_specs=[vmem] * 4,
        out_specs=vmem,
        compiler_params=pltpu.CompilerParams(vmem_limit_bytes=vlim),
        cost_estimate=pl.CostEstimate(flops=2 * B * _LANES * _LANES,
                                      transcendentals=B * _LANES,
                                      bytes_accessed=bytes2),
    )(g_part, y.astype(f32), wall_pad, prm)

    return out[:, :z_dim], out[:, z_dim: 2 * z_dim]


# --------------------------------------------------------------------------- #
# Pure-JAX reference (same bf16-operand / f32-accumulation math)
# --------------------------------------------------------------------------- #
def _reference(x, a, pool, y, p):
    bf16, f32 = jnp.bfloat16, jnp.float32
    xw = jnp.dot(x.astype(bf16), p["w_emb"].astype(bf16), preferred_element_type=f32)
    h = jnp.maximum(
        jnp.dot(a.astype(bf16), xw.astype(bf16), preferred_element_type=f32)
        + p["b_emb"], 0.0)
    g = jnp.dot(pool.astype(bf16), h.astype(bf16), preferred_element_type=f32)

    def head(wh, wy, b, gamma, beta):
        lin = (jnp.dot(g.astype(bf16), wh.astype(bf16), preferred_element_type=f32)
               + y * wy + b)
        mean = jnp.mean(lin, axis=0, keepdims=True)
        var = jnp.mean((lin - mean) ** 2, axis=0, keepdims=True)
        bn = (lin - mean) * jax.lax.rsqrt(var + _EPS) * gamma + beta
        return jnp.maximum(bn, 0.0)

    z_mu = head(p["w_mu_h"], p["w_mu_y"], p["b_mu"], p["gamma_mu"], p["beta_mu"])
    z_var = head(p["w_var_h"], p["w_var_y"], p["b_var"], p["gamma_var"], p["beta_var"])
    return z_mu, jax.nn.sigmoid(z_var)


# --------------------------------------------------------------------------- #
if __name__ == "__main__":
    # Shapes chosen to exercise the tiled path: N=512 nodes (4 row tiles of 128,
    # 2 parallel slices x 2 reduction steps), B=8 graphs of 64 nodes each.
    N, X_DIM, H_DIM, Z_DIM, B = 512, 8, 32, 16, 8
    NPG = N // B

    key = jax.random.PRNGKey(0)
    ks = jax.random.split(key, 12)

    # ---- synthetic graph data -------------------------------------------------
    x = jax.random.normal(ks[0], (N, X_DIM), jnp.float32)
    batch = jnp.repeat(jnp.arange(B), NPG)                            # [N]
    src = jnp.arange(N)
    dst = (src % NPG + 1) % NPG + (src // NPG) * NPG                  # ring per graph
    edge_index = jnp.stack([src, dst])                                # [2, E]
    edge_weights = jax.random.uniform(ks[1], (N,), jnp.float32, 0.1, 1.0)

    # Dense weighted adjacency (glue, plain JAX); stored bf16 ONCE so the kernel
    # never pays an extra N^2 f32->bf16 HBM round trip per call.
    a_f32 = jnp.zeros((N, N), jnp.float32).at[edge_index[1], edge_index[0]].add(edge_weights)
    a_bf16 = a_f32.astype(jnp.bfloat16)
    # Mean-pooling matrix from `batch` (glue, plain JAX), kept f32.
    onehot = (batch[None, :] == jnp.arange(B)[:, None]).astype(jnp.float32)   # [B, N]
    pool = onehot / jnp.sum(onehot, axis=1, keepdims=True)

    y_target = jax.random.normal(ks[2], (B, 1), jnp.float32)

    # ---- deterministic parameters (PyTorch-style uniform init) -----------------
    def lin_init(k, fan_in, shape):
        bound = 1.0 / jnp.sqrt(float(fan_in))
        return jax.random.uniform(k, shape, jnp.float32, -bound, bound)

    params = {
        # synthetic embedder (stand-in for the external module)
        "w_emb": lin_init(ks[3], X_DIM, (X_DIM, H_DIM)),
        "b_emb": lin_init(ks[4], X_DIM, (1, H_DIM)),
        # encoder_mean: Linear(h_dim+1, z_dim) split into [h_dim part | y part]
        "w_mu_h": lin_init(ks[5], H_DIM + 1, (H_DIM, Z_DIM)),
        "w_mu_y": lin_init(ks[6], H_DIM + 1, (1, Z_DIM)),
        "b_mu": lin_init(ks[7], H_DIM + 1, (1, Z_DIM)),
        "gamma_mu": jnp.ones((1, Z_DIM), jnp.float32),
        "beta_mu": jnp.zeros((1, Z_DIM), jnp.float32),
        # encoder_var
        "w_var_h": lin_init(ks[8], H_DIM + 1, (H_DIM, Z_DIM)),
        "w_var_y": lin_init(ks[9], H_DIM + 1, (1, Z_DIM)),
        "b_var": lin_init(ks[10], H_DIM + 1, (1, Z_DIM)),
        "gamma_var": jnp.ones((1, Z_DIM), jnp.float32),
        "beta_var": jnp.zeros((1, Z_DIM), jnp.float32),
    }

    z_mu, z_logvar = graph_encoder(x, a_bf16, pool, y_target, params, tile_rows=128)
    jax.block_until_ready((z_mu, z_logvar))

    ref_mu, ref_logvar = _reference(x, a_f32, pool, y_target, params)
    assert z_mu.shape == (B, Z_DIM) and z_logvar.shape == (B, Z_DIM)
    # Tolerance reflects bf16 MXU operands (kernel and reference cast identically)
    # plus tiny f32 reassociation from the tiled pool accumulation before BatchNorm.
    assert jnp.allclose(z_mu, ref_mu, atol=5e-3, rtol=5e-3)
    assert jnp.allclose(z_logvar, ref_logvar, atol=5e-3, rtol=5e-3)

    print("KERNEL_OK")
</pallas_src>

<mosaic_0001>
module attributes {stable_mosaic.version = 11 : i64} {
  func.func @_graph_pool_kernel(%arg0: i32, %arg1: i32, %arg2: memref<512x8xbf16, #tpu.memory_space<vmem>>, %arg3: memref<128x512xbf16, #tpu.memory_space<vmem>>, %arg4: memref<8x128xf32, #tpu.memory_space<vmem>>, %arg5: memref<8x128xbf16, #tpu.memory_space<vmem>>, %arg6: memref<8x128xf32, #tpu.memory_space<vmem>>, %arg7: memref<1x8x128xf32, #tpu.memory_space<vmem>>, %arg8: memref<512x128xbf16, #tpu.memory_space<vmem>>) attributes {dimension_semantics = [#tpu.dimension_semantics<parallel>, #tpu.dimension_semantics<arbitrary>], iteration_bounds = array<i64: 2, 2>, scalar_prefetch = 0 : i64, scratch_operands = 1 : i64, tpu.core_type = #tpu.core_type<tc>, window_params = [{pipeline_mode = #tpu.pipeline_mode<synchronous>, transform_indices = @transform_0, window_bounds = array<i64: 512, 8>}, {transform_indices = @transform_1, window_bounds = array<i64: 128, 512>}, {transform_indices = @transform_2, window_bounds = array<i64: 8, 128>}, {pipeline_mode = #tpu.pipeline_mode<synchronous>, transform_indices = @transform_3, window_bounds = array<i64: 8, 128>}, {pipeline_mode = #tpu.pipeline_mode<synchronous>, transform_indices = @transform_4, window_bounds = array<i64: 8, 128>}, {transform_indices = @transform_5, window_bounds = array<i64: 1, 8, 128>}]} {
    %c0_i32 = arith.constant 0 : i32
    %0 = arith.cmpi eq, %arg1, %c0_i32 : i32
    %1 = arith.extui %0 : i1 to i32
    %c0_i32_0 = arith.constant 0 : i32
    %2 = arith.cmpi ne, %1, %c0_i32_0 : i32
    scf.if %2 {
      %c0_16 = arith.constant 0 : index
      %c0_17 = arith.constant 0 : index
      %21 = vector.load %arg2[%c0_16, %c0_17] : memref<512x8xbf16, #tpu.memory_space<vmem>>, vector<512x8xbf16>
      %c0_18 = arith.constant 0 : index
      %c0_19 = arith.constant 0 : index
      %22 = vector.load %arg5[%c0_18, %c0_19] : memref<8x128xbf16, #tpu.memory_space<vmem>>, vector<8x128xbf16>
      %cst_20 = arith.constant dense<0.000000e+00> : vector<512x128xf32>
      %23 = tpu.matmul %21, %22, %cst_20 {dimension_numbers = #tpu.dot_dimension_numbers<[1], [0], [0], [1], [0, 0, 1, 1], [], []>} : vector<512x8xbf16>, vector<8x128xbf16>, vector<512x128xf32> -> vector<512x128xf32>
      %24 = arith.truncf %23 : vector<512x128xf32> to vector<512x128xbf16>
      %c0_21 = arith.constant 0 : index
      %c0_22 = arith.constant 0 : index
      %25 = vector.load %arg8[%c0_21, %c0_22] : memref<512x128xbf16, #tpu.memory_space<vmem>>, vector<512x128xbf16>
      tpu.vector_store %arg8[%c0_21, %c0_22], %24 {strides = array<i32>} : memref<512x128xbf16, #tpu.memory_space<vmem>>, vector<512x128xbf16>,
      %cst_23 = arith.constant 0.000000e+00 : f32
      %26 = vector.broadcast %cst_23 : f32 to vector<8x128xf32>
      %c0_24 = arith.constant 0 : index
      %c0_25 = arith.constant 0 : index
      %c0_26 = arith.constant 0 : index
      %27 = vector.load %arg7[%c0_24, %c0_25, %c0_26] : memref<1x8x128xf32, #tpu.memory_space<vmem>>, vector<1x8x128xf32>
      %28 = vector.shape_cast %27 : vector<1x8x128xf32> to vector<8x128xf32>
      %29 = vector.shape_cast %26 : vector<8x128xf32> to vector<1x8x128xf32>
      tpu.vector_store %arg7[%c0_24, %c0_25, %c0_26], %29 {strides = array<i32>} : memref<1x8x128xf32, #tpu.memory_space<vmem>>, vector<1x8x128xf32>,
    } else {
    }
    %c0 = arith.constant 0 : index
    %c0_1 = arith.constant 0 : index
    %3 = vector.load %arg3[%c0, %c0_1] : memref<128x512xbf16, #tpu.memory_space<vmem>>, vector<128x512xbf16>
    %c0_2 = arith.constant 0 : index
    %c0_3 = arith.constant 0 : index
    %4 = vector.load %arg8[%c0_2, %c0_3] : memref<512x128xbf16, #tpu.memory_space<vmem>>, vector<512x128xbf16>
    %cst = arith.constant dense<0.000000e+00> : vector<128x128xf32>
    %5 = tpu.matmul %3, %4, %cst {dimension_numbers = #tpu.dot_dimension_numbers<[1], [0], [0], [1], [0, 0, 1, 1], [], []>} : vector<128x512xbf16>, vector<512x128xbf16>, vector<128x128xf32> -> vector<128x128xf32>
    %c0_4 = arith.constant 0 : index
    %c0_5 = arith.constant 0 : index
    %6 = vector.load %arg6[%c0_4, %c0_5] : memref<8x128xf32, #tpu.memory_space<vmem>>, vector<1x128xf32>
    %7 = vector.broadcast %6 : vector<1x128xf32> to vector<128x128xf32>
    %8 = arith.addf %5, %7 : vector<128x128xf32>
    %cst_6 = arith.constant 0.000000e+00 : f32
    %9 = vector.broadcast %cst_6 : f32 to vector<128x128xf32>
    %10 = arith.maximumf %8, %9 : vector<128x128xf32>
    %c0_7 = arith.constant 0 : index
    %c0_8 = arith.constant 0 : index
    %c0_9 = arith.constant 0 : index
    %11 = vector.load %arg7[%c0_7, %c0_8, %c0_9] : memref<1x8x128xf32, #tpu.memory_space<vmem>>, vector<1x8x128xf32>
    %12 = vector.shape_cast %11 : vector<1x8x128xf32> to vector<8x128xf32>
    %c0_10 = arith.constant 0 : index
    %c0_11 = arith.constant 0 : index
    %13 = vector.load %arg4[%c0_10, %c0_11] : memref<8x128xf32, #tpu.memory_space<vmem>>, vector<8x128xf32>
    %14 = arith.truncf %13 : vector<8x128xf32> to vector<8x128xbf16>
    %15 = arith.truncf %10 : vector<128x128xf32> to vector<128x128xbf16>
    %cst_12 = arith.constant dense<0.000000e+00> : vector<8x128xf32>
    %16 = tpu.matmul %14, %15, %cst_12 {dimension_numbers = #tpu.dot_dimension_numbers<[1], [0], [0], [1], [0, 0, 1, 1], [], []>} : vector<8x128xbf16>, vector<128x128xbf16>, vector<8x128xf32> -> vector<8x128xf32>
    %17 = arith.addf %12, %16 : vector<8x128xf32>
    %c0_13 = arith.constant 0 : index
    %c0_14 = arith.constant 0 : index
    %c0_15 = arith.constant 0 : index
    %18 = vector.load %arg7[%c0_13, %c0_14, %c0_15] : memref<1x8x128xf32, #tpu.memory_space<vmem>>, vector<1x8x128xf32>
    %19 = vector.shape_cast %18 : vector<1x8x128xf32> to vector<8x128xf32>
    %20 = vector.shape_cast %17 : vector<8x128xf32> to vector<1x8x128xf32>
    tpu.vector_store %arg7[%c0_13, %c0_14, %c0_15], %20 {strides = array<i32>} : memref<1x8x128xf32, #tpu.memory_space<vmem>>, vector<1x8x128xf32>,
    return
  }
  func.func @transform_0(%arg0: i32, %arg1: i32) -> (i32, i32) {
    %c0_i32 = arith.constant 0 : i32
    %c0_i32_0 = arith.constant 0 : i32
    %c0_i32_1 = arith.constant 0 : i32
    return %c0_i32, %c0_i32_0 : i32, i32
  }
  func.func @transform_1(%arg0: i32, %arg1: i32) -> (i32, i32) {
    %c2_i32 = arith.constant 2 : i32
    %0 = arith.muli %arg0, %c2_i32 : i32
    %1 = arith.addi %0, %arg1 : i32
    %c0_i32 = arith.constant 0 : i32
    %c0_i32_0 = arith.constant 0 : i32
    return %1, %c0_i32 : i32, i32
  }
  func.func @transform_2(%arg0: i32, %arg1: i32) -> (i32, i32) {
    %c2_i32 = arith.constant 2 : i32
    %0 = arith.muli %arg0, %c2_i32 : i32
    %1 = arith.addi %0, %arg1 : i32
    %c0_i32 = arith.constant 0 : i32
    %c0_i32_0 = arith.constant 0 : i32
    return %c0_i32, %1 : i32, i32
  }
  func.func @transform_3(%arg0: i32, %arg1: i32) -> (i32, i32) {
    %c0_i32 = arith.constant 0 : i32
    %c0_i32_0 = arith.constant 0 : i32
    %c0_i32_1 = arith.constant 0 : i32
    return %c0_i32, %c0_i32_0 : i32, i32
  }
  func.func @transform_4(%arg0: i32, %arg1: i32) -> (i32, i32) {
    %c0_i32 = arith.constant 0 : i32
    %c0_i32_0 = arith.constant 0 : i32
    %c0_i32_1 = arith.constant 0 : i32
    return %c0_i32, %c0_i32_0 : i32, i32
  }
  func.func @transform_5(%arg0: i32, %arg1: i32) -> (i32, i32, i32) {
    %c0_i32 = arith.constant 0 : i32
    %c0_i32_0 = arith.constant 0 : i32
    %c0_i32_1 = arith.constant 0 : i32
    return %arg0, %c0_i32, %c0_i32_0 : i32, i32, i32
  }
}

</mosaic_0001>

<bundles_post_ra>
// kernel: tpu_custom_call.1
= control target key start
LH: loop header
LB: loop body
LE: loop exit
PB: predicated region body
PF: predicated region fallthrough
CT: control target
= control target key end

     0   :  { %10 = vsyncpa [#allocation4], 0  ;;  %s3654_s0 = inlined_call_operand.vmem [shape: bf16[512,8], index: 0, kind: input, shape index: {}]   ;;  %s3655_s1 = inlined_call_operand.hbm [shape: bf16[512,512], index: 1, kind: input, shape index: {}]   ;;  %s3656_s2 = inlined_call_operand.vmem [shape: f32[8,512], index: 2, kind: input, shape index: {}]   ;;  %s3657_s3 = inlined_call_operand.vmem [shape: bf16[8,128], index: 3, kind: input, shape index: {}]   ;;  %s3658_s4 = inlined_call_operand.vmem [shape: f32[8,128], index: 4, kind: input, shape index: {}]   ;;  %s3659_s5 = inlined_call_operand.hbm [shape: f32[2,8,128], index: 5, kind: output, shape index: {}]  }
   0x1   :  { %12 = vsyncpa [#allocation4 + $0x1], 0 }
   0x2   :  { %13 = vsyncpa [#allocation5], 0 }
   0x3   :  { %15 = vsyncpa [#allocation5 + $0x1], 0  ;;  %s3201_s18 = smov 0   ;;  %s3203_s19 = smov 0  }
   0x4   :  { %s3205_s20 = smov 0   ;;  %s3207_s21 = smov 0  }
   0x5   :  { %s3209_s22 = smov 0   ;;  %s3211_s23 = smov 0  }
   0x6   :  { %s3213_s24 = smov 0   ;;  %s3215_s25 = smov 0  }
   0x7   :  { %s3217_s26 = smov 0   ;;  %s3219_s27 = smov 0  }
   0x8   :  { %s3221_s28 = smov 0  }
   0x9 LB: > { %3665 = sst [smem:[#allocation9_spill]] %s3142_s23  ;;  %s2062_s29 = sadd.s32 4294967295, %s3162_s28   ;;  %s3162_s28 = sphi %s3221_s28, %s21_s28   ;;  %s3158_s27 = sphi %s3219_s27, %s3682_s27   ;;  %s3154_s26 = sphi %s3217_s26, %s3681_s26   ;;  %s3150_s25 = sphi %s3215_s25, %s3680_s25   ;;  %s3146_s24 = sphi %s3213_s24, %s3679_s24   ;;  %s3142_s23 = sphi %s3211_s23, %s3678_s23   ;;  %s3138_s22 = sphi %s3209_s22, %s3687_s22   ;;  %s3134_s21 = sphi %s3207_s21, %s3686_s21   ;;  %s3130_s20 = sphi %s3205_s20, %s3685_s20   ;;  %s3126_s19 = sphi %s3203_s19, %s3684_s19   ;;  %s3122_s18 = sphi %s3201_s18, %s3683_s18  }
   0xa   : > { %3666 = sst [smem:[#allocation10_spill]] %s3154_s26  ;;  %s30_s6 = sadd.s32 1, %s3154_s26 }
   0xb   : > { %3667 = sst [smem:[#allocation11_spill]] %s3158_s27  ;;  %s33_s7 = sadd.s32 1, %s3158_s27 }
   0xc   : > { %p31_p0 = scmp.ge.s32.totalorder %s30_s6, 2  ;;  %s2064_s8 = sshll.u32 %s3158_s27, 1 }
   0xd   : > { %s3260_s9 = sadd.s32 %s3154_s26, %s2064_s8  ;;  %s65_s10 = sadd.s32 1, %s3142_s23 }
   0xe   : > { %s3689_s6 = smov (%p31_p0, %s30_s6), 0  ;;  %s3691_s7 = smov (!%p31_p0, %s33_s7), %s3158_s27 }
   0xf   : > { %3668 = sst [smem:[#allocation12_spill]] %s3689_s6  ;;  %p72_p1 = scmp.ne.s32.totalorder %s3142_s23, %s3138_s22 }
  0x10   : > { %p73_p2 = scmp.eq.s32.totalorder %s3162_s28, 0  ;;  %p35_p3 = scmp.ge.s32.totalorder %s3691_s7, 2 }
  0x11   : > { %p78_p4 = scmp.ne.s32.totalorder %s3138_s22, %s3134_s21  ;;  %p79_p6 = scmp.eq.s32.totalorder %s2062_s29, 0 }
  0x12   : > { %p3270_p5 = por %p73_p2, %p72_p1  ;;  %s3693_s7 = smov (%p35_p3, %s3691_s7), 0 }
  0x13   : > { %3670 = sst [smem:[#allocation13_spill]] %s3693_s7  ;;  %p3276_p7 = por %p79_p6, %p78_p4 }
  0x14   : > { %s163_s13 = sadd.s32 1, %s3130_s20  ;;  %s2065_s14 = sshll.u32 %s3693_s7, 1 }
  0x15   : > { %s160_s15 = ssub.s32 %s3158_s27, %s3693_s7  ;;  %s61_s16 = sadd.s32 %s2065_s14, %s3689_s6 }
  0x16   : > { %p161_p8 = scmp.eq.s32.totalorder %s160_s15, 0  ;;  %s62_s17 = ssub.s32 %s3260_s9, %s61_s16 }
  0x17   : > { %p173_p9 = scmp.ne.s32.totalorder %s3130_s20, %s3126_s19  ;;  %p63_p10 = scmp.eq.s32.totalorder %s62_s17, 0 }
  0x18   : > { %p174_p11 = scmp.eq.s32.totalorder %s2062_s29, 3  ;;  %p179_p13 = scmp.ne.s32.totalorder %s3126_s19, %s3122_s18 }
  0x19   : > { %s3289_s21 = scalar_select %p161_p8, %s3130_s20, %s163_s13  }
  0x1a   : > { %s3292_s8 = scalar_select %p63_p10, %s3142_s23, %s65_s10  }
  0x1b   : > { %p3294_p12 = por %p174_p11, %p173_p9  ;;  %s3674_s26 = sadd.s32 4294967294, %s3162_s28  }
  0x1c   : > { %3672 = sst [smem:[#allocation14_spill]] %s3292_s8  ;;  %p180_p0 = scmp.eq.s32.totalorder %s3674_s26, 3 }
  0x1d   : > { %p2807_p1 = scmp.lt.s32.totalorder %s3162_s28, 4  ;;  %s209_s7 = sand.u32 1, %s3142_s23  }
  0x1e   : > { %p3304_p2 = por %p180_p0, %p179_p13  ;;  %s2070_s15 = sshll.u32 %s209_s7, 8 }
  0x1f   : > { %s2279_s16 = sshll.u32 %s3260_s9, 12  ;;  %s213_s17 = scalar_lea.vmem [#allocation3], %s2070_s15 }
  0x20   : > { %s222_s10 = scalar_lea.hbm %s3655_s1, %s2279_s16  ;;  %s223_s6 = sshll.u32 %s213_s17, 4  ;;  %s224_s6 = int_to_ptr.vmem [resolvable:$true] %s223_s6 }
  0x21   : > { %p3314_p3 = pnand %p2807_p1, %p3270_p5  ;;  %s210_s26 = scalar_lea.sflag [#allocation4], %s209_s7 }
  0x22   : > { %s3027_s8 = scalar_lea.vmem %s224_s6, 4096  ;;  %s3164_s9 = smov [#allocation3]  }
  0x23   : > { %p3016_p4 = pneg %p3314_p3  ;;  %p3028_p6 = scmp.ne.s32.totalorder %s224_s6, %s3027_s8 }
  0x24   : > { %s3032_s23 = sshll.u32 %s3164_s9, 4  ;;  %s3033_s23 = int_to_ptr.vmem [resolvable:$false] %s3032_s23 }
  0x25   : > { %p3030_p8 = pnand %p3028_p6, %p3016_p4  ;;  %s3034_s16 = scalar_lea.vmem %s3033_s23, 8192 }
  0x26   : > { %p3035_p10 = scmp.lt.s32.totalorder %s224_s6, %s3033_s23  ;;  %p3036_p11 = scmp.lt.s32.totalorder %s3034_s16, %s3027_s8 }
  0x27   : > { %p3031_p9 = pneg %p3030_p8 }
  0x28   : > { %p3037_p13 = por %p3036_p11, %p3035_p10 }
  0x2a   : > { %p3038_p5 = pnand %p3037_p13, %p3031_p9 }
  0x2c   : > { %3041 = shalt.err (!%p3038_p5)
}
  0x2d   : > { %s3165_s11 = smov 256   ;;  %s3166_s7 = smov 16  }
  0x2e   : > { %2802 = dma.hbm_to_vmem [thread:$0]  (!%p3314_p3), %s222_s10, 4096, %s224_s6, %s210_s26, %s3165_s11, %s3165_s11, %s3166_s7  }
  0x2f   : > { %p2075_p0 = scmp.ge.s32.totalorder %s3162_s28, 1  ;;  %p242_p1 = scmp.lt.s32.totalorder %s3162_s28, 5 }
  0x31   : > { %p243_p4 = pnand %p2075_p0, %p242_p1 }
  0x32   : > { %s248_s15 = sand.u32 (!%p243_p4), 1, %s3138_s22  }
  0x33   : > { %246 = sbr.rel (%p243_p4) target bundleno = 872 (0x368), region = 40  ;;  %s2076_s29 = sshll.u32 (!%p243_p4), %s248_s15, 8 }
  0x34   : > { %s249_s23 = scalar_lea.sflag (!%p243_p4), [#allocation4], %s248_s15  ;;  %s3325_s8 = scalar_lea.vmem (!%p243_p4), [#allocation3], %s2076_s29 }
  0x38   : > { %3113 = dma.done.wait (%p3276_p7), %s249_s23, 4096  }
  0x39   : > { %3115 = vsyncadd (%p3276_p7), %s249_s23, 4294963200  ;;  %s282_s27 = sand.u32 1, %s3126_s19   ;;  %s2078_s6 = sshll.u32 %s3150_s25, 1 }
  0x3a   : > { %s2077_s13 = sshll.u32 %s282_s27, 3  ;;  %s289_s10 = sadd.s32 %s3146_s24, %s2078_s6 }
  0x3b   : > { %p290_p3 = scmp.lt.s32.totalorder %s289_s10, 3  ;;  %s3341_s11 = scalar_lea.vmem [#allocation6], %s2077_s13 }
  0x3c   : > { %p2080_p7 = scmp.ne.s32.totalorder %s3146_s24, 0 }
  0x3d   : > { %s3695_s10 = smov (!%p290_p3, %s289_s10), 3 }
  0x3e   : > { %s2079_s17 = sshll.u32 %s3695_s10, 3  ;;  %300 = sbr.rel (%p2080_p7) target bundleno = 330 (0x14a), region = 48 }
  0x3f   : > { %s3339_s16 = scalar_lea.vmem %s3656_s2, %s2079_s17 }
  0x43   : > { %v365_v0 = vld [vmem:[%s3657_s3] sm:$0xf]  ;;  %vm623_vm0 = vcmask 1043456   ;;  %vm526_vm1 = vcmask 64512   ;;  %v2904_v4 = vld [vmem:[%s3654_s0 + $0x8] sm:$0xff]   ;;  %v2906_v6 = vld [vmem:[%s3654_s0 + $0x10] sm:$0xff]  }
  0x44   : > { %v2902_v1 = vld [vmem:[%s3654_s0] sm:$0xff]   ;;  %2793 = vmatprep.subr.msk.bf16.mxu0 %vm623_vm0, %v365_v0  ;;  %2794 = vmatprep.subr.msk.bf16.mxu1 %vm623_vm0, %v365_v0  ;;  %v625_v2 = vsel %vm623_vm0, %v365_v0, 0  ;;  %v2905_v5 = vld [vmem:[%s3654_s0 + $0x88] sm:$0xff]   ;;  %v2907_v7 = vld [vmem:[%s3654_s0 + $0x90] sm:$0xff]   ;;  %v3167_v34 = vmov 0.0  }
  0x45   : > { %2706 = vmatpush3.bf16.msra.mxu0 %v625_v2  ;;  %2792 = vmatpush3.bf16.msra.mxu1 %v625_v2  ;;  %v2903_v3 = vld [vmem:[%s3654_s0 + $0x80] sm:$0xff]   ;;  %v2908_v8 = vld [vmem:[%s3654_s0 + $0x18] sm:$0xff]   ;;  %v2912_v12 = vld [vmem:[%s3654_s0 + $0x28] sm:$0xff]   ;;  %1236 = vst [vmem:[%s3341_s11] sm:$0xff] %v3167_v34 }
  0x46   : > { %2707 = vmatprep.mubr.msk.bf16.mxu0 %vm526_vm1, %v2902_v1  ;;  %2739 = vmatprep.mubr.msk.bf16.mxu1 %vm526_vm1, %v2903_v3  ;;  %v2909_v9 = vld [vmem:[%s3654_s0 + $0x98] sm:$0xff]   ;;  %v2910_v10 = vld [vmem:[%s3654_s0 + $0x20] sm:$0xff]   ;;  %v2913_v13 = vld [vmem:[%s3654_s0 + $0xa8] sm:$0xff]  }
  0x47   : > { %v2911_v11 = vld [vmem:[%s3654_s0 + $0xa0] sm:$0xff]   ;;  %v2914_v14 = vld [vmem:[%s3654_s0 + $0x30] sm:$0xff]   ;;  %v2916_v16 = vld [vmem:[%s3654_s0 + $0x38] sm:$0xff]  }
  0x48   : > { %2708 = vmatmul.mubr.msk.bf16.vlgmr.msra.gmra.mxu0 %vm526_vm1, %v2904_v4  ;;  %2740 = vmatmul.mubr.msk.bf16.vlgmr.msra.gmra.mxu1 %vm526_vm1, %v2905_v5  ;;  %v2915_v15 = vld [vmem:[%s3654_s0 + $0xb0] sm:$0xff]   ;;  %v2917_v17 = vld [vmem:[%s3654_s0 + $0xb8] sm:$0xff]   ;;  %v2918_v18 = vld [vmem:[%s3654_s0 + $0x40] sm:$0xff]  }
  0x49   : > { %2711 = vmatprep.mubr.msk.bf16.mxu0 %vm526_vm1, %v2906_v6  ;;  %2743 = vmatprep.mubr.msk.bf16.mxu1 %vm526_vm1, %v2907_v7  ;;  %v2919_v19 = vld [vmem:[%s3654_s0 + $0xc0] sm:$0xff]   ;;  %v2920_v20 = vld [vmem:[%s3654_s0 + $0x48] sm:$0xff]   ;;  %v2922_v22 = vld [vmem:[%s3654_s0 + $0x50] sm:$0xff]  }
  0x4a   : > { %v2921_v21 = vld [vmem:[%s3654_s0 + $0xc8] sm:$0xff]   ;;  %v2923_v23 = vld [vmem:[%s3654_s0 + $0xd0] sm:$0xff]   ;;  %v2924_v24 = vld [vmem:[%s3654_s0 + $0x58] sm:$0xff]  }
  0x4b   : > { %v2925_v25 = vld [vmem:[%s3654_s0 + $0xd8] sm:$0xff]   ;;  %v2926_v26 = vld [vmem:[%s3654_s0 + $0x60] sm:$0xff]   ;;  %v2928_v28 = vld [vmem:[%s3654_s0 + $0x68] sm:$0xff]  }
  0x4c   : > { %v2927_v27 = vld [vmem:[%s3654_s0 + $0xe0] sm:$0xff]   ;;  %v2929_v29 = vld [vmem:[%s3654_s0 + $0xe8] sm:$0xff]   ;;  %v2930_v30 = vld [vmem:[%s3654_s0 + $0x70] sm:$0xff]  }
  0x4d   : > { %v2931_v31 = vld [vmem:[%s3654_s0 + $0xf0] sm:$0xff]   ;;  %v2932_v32 = vld [vmem:[%s3654_s0 + $0x78] sm:$0xff]  }
  0x4e   : > { %v2933_v33 = vld [vmem:[%s3654_s0 + $0xf8] sm:$0xff]  }
  0x50   : > { %2712 = vmatmul.mubr.msk.bf16.gmra.mxu0 %vm526_vm1, %v2908_v8  ;;  %2744 = vmatmul.mubr.msk.bf16.gmra.mxu1 %vm526_vm1, %v2909_v9 }
  0x51   : > { %2715 = vmatprep.mubr.msk.bf16.mxu0 %vm526_vm1, %v2910_v10  ;;  %2747 = vmatprep.mubr.msk.bf16.mxu1 %vm526_vm1, %v2911_v11 }
  0x58   : > { %2716 = vmatmul.mubr.msk.bf16.gmra.mxu0 %vm526_vm1, %v2912_v12  ;;  %2748 = vmatmul.mubr.msk.bf16.gmra.mxu1 %vm526_vm1, %v2913_v13 }
  0x59   : > { %2719 = vmatprep.mubr.msk.bf16.mxu0 %vm526_vm1, %v2914_v14  ;;  %2751 = vmatprep.mubr.msk.bf16.mxu1 %vm526_vm1, %v2915_v15 }
  0x60   : > { %2720 = vmatmul.mubr.msk.bf16.gmra.mxu0 %vm526_vm1, %v2916_v16  ;;  %2752 = vmatmul.mubr.msk.bf16.gmra.mxu1 %vm526_vm1, %v2917_v17 }
  0x61   : > { %2723 = vmatprep.mubr.msk.bf16.mxu0 %vm526_vm1, %v2918_v18  ;;  %2755 = vmatprep.mubr.msk.bf16.mxu1 %vm526_vm1, %v2919_v19 }
  0x68   : > { %2724 = vmatmul.mubr.msk.bf16.gmra.mxu0 %vm526_vm1, %v2920_v20  ;;  %2756 = vmatmul.mubr.msk.bf16.gmra.mxu1 %vm526_vm1, %v2921_v21 }
  0x69   : > { %2727 = vmatprep.mubr.msk.bf16.mxu0 %vm526_vm1, %v2922_v22  ;;  %2759 = vmatprep.mubr.msk.bf16.mxu1 %vm526_vm1, %v2923_v23 }
  0x70   : > { %2728 = vmatmul.mubr.msk.bf16.gmra.mxu0 %vm526_vm1, %v2924_v24  ;;  %2760 = vmatmul.mubr.msk.bf16.gmra.mxu1 %vm526_vm1, %v2925_v25 }
  0x71   : > { %2731 = vmatprep.mubr.msk.bf16.mxu0 %vm526_vm1, %v2926_v26  ;;  %2763 = vmatprep.mubr.msk.bf16.mxu1 %vm526_vm1, %v2927_v27 }
  0x78   : > { %2732 = vmatmul.mubr.msk.bf16.gmra.mxu0 %vm526_vm1, %v2928_v28  ;;  %2764 = vmatmul.mubr.msk.bf16.gmra.mxu1 %vm526_vm1, %v2929_v29 }
  0x79   : > { %2735 = vmatprep.mubr.msk.bf16.mxu0 %vm526_vm1, %v2930_v30  ;;  %2767 = vmatprep.mubr.msk.bf16.mxu1 %vm526_vm1, %v2931_v31 }
  0x80   : > { %2736 = vmatmul.mubr.msk.bf16.gmra.mxu0 %vm526_vm1, %v2932_v32  ;;  %2768 = vmatmul.mubr.msk.bf16.gmra.mxu1 %vm526_vm1, %v2933_v33 }
 0x108   : > { %v2709_v35 = vpop.f32.mrf.mxu0  ;;  %v2741_v36 = vpop.f32.mrf.mxu1 }
 0x10a   : > { %v661_v37 = vpop.f32.mrf.mxu0  ;;  %v789_v38 = vpop.f32.mrf.mxu1 }
 0x10c   : > { %v2710_v39 = vpop.f32.mrf.mxu0  ;;  %v2742_v41 = vpop.f32.mrf.mxu1 }
 0x10d   : > { %v2352_v40 = vpack.c.bf16 %v2710_v39, %v2709_v35  ;;  %v2432_v42 = vpack.c.bf16 %v2742_v41, %v2741_v36 }
 0x10e   : > { %v664_v43 = vpop.f32.mrf.mxu0  ;;  %v792_v45 = vpop.f32.mrf.mxu1 }
 0x10f   : > { %2504 = vst [vmem:[#allocation2 + $0x8] sm:$0xff] %v2352_v40   ;;  %v2347_v44 = vpack.c.bf16 %v664_v43, %v661_v37  ;;  %2520 = vst [vmem:[#allocation2 + $0x88] sm:$0xff] %v2432_v42   ;;  %v2427_v46 = vpack.c.bf16 %v792_v45, %v789_v38 }
 0x110   : > { %v2713_v47 = vpop.f32.mrf.mxu0  ;;  %v2745_v48 = vpop.f32.mrf.mxu1 }
 0x111   : > { %2348 = vst [vmem:[#allocation2] sm:$0xff] %v2347_v44   ;;  %2519 = vst [vmem:[#allocation2 + $0x80] sm:$0xff] %v2427_v46  }
 0x112   : > { %v677_v49 = vpop.f32.mrf.mxu0  ;;  %v805_v50 = vpop.f32.mrf.mxu1 }
 0x114   : > { %v2714_v51 = vpop.f32.mrf.mxu0  ;;  %v2746_v53 = vpop.f32.mrf.mxu1 }
 0x115   : > { %v2362_v52 = vpack.c.bf16 %v2714_v51, %v2713_v47  ;;  %v2442_v54 = vpack.c.bf16 %v2746_v53, %v2745_v48 }
 0x116   : > { %v680_v55 = vpop.f32.mrf.mxu0  ;;  %v808_v57 = vpop.f32.mrf.mxu1 }
 0x117   : > { %2506 = vst [vmem:[#allocation2 + $0x18] sm:$0xff] %v2362_v52   ;;  %v2357_v56 = vpack.c.bf16 %v680_v55, %v677_v49  ;;  %2522 = vst [vmem:[#allocation2 + $0x98] sm:$0xff] %v2442_v54   ;;  %v2437_v58 = vpack.c.bf16 %v808_v57, %v805_v50 }
 0x118   : > { %v2717_v59 = vpop.f32.mrf.mxu0  ;;  %v2749_v60 = vpop.f32.mrf.mxu1 }
 0x119   : > { %2505 = vst [vmem:[#allocation2 + $0x10] sm:$0xff] %v2357_v56   ;;  %2521 = vst [vmem:[#allocation2 + $0x90] sm:$0xff] %v2437_v58  }
 0x11a   : > { %v693_v61 = vpop.f32.mrf.mxu0  ;;  %v821_v62 = vpop.f32.mrf.mxu1 }
 0x11c   : > { %v2718_v63 = vpop.f32.mrf.mxu0  ;;  %v2750_v1 = vpop.f32.mrf.mxu1 }
 0x11d   : > { %v2372_v0 = vpack.c.bf16 %v2718_v63, %v2717_v59  ;;  %v2452_v2 = vpack.c.bf16 %v2750_v1, %v2749_v60 }
 0x11e   : > { %v696_v3 = vpop.f32.mrf.mxu0  ;;  %v824_v5 = vpop.f32.mrf.mxu1 }
 0x11f   : > { %2508 = vst [vmem:[#allocation2 + $0x28] sm:$0xff] %v2372_v0   ;;  %v2367_v4 = vpack.c.bf16 %v696_v3, %v693_v61  ;;  %2524 = vst [vmem:[#allocation2 + $0xa8] sm:$0xff] %v2452_v2   ;;  %v2447_v6 = vpack.c.bf16 %v824_v5, %v821_v62 }
 0x120   : > { %v2721_v7 = vpop.f32.mrf.mxu0  ;;  %v2753_v8 = vpop.f32.mrf.mxu1 }
 0x121   : > { %2507 = vst [vmem:[#allocation2 + $0x20] sm:$0xff] %v2367_v4   ;;  %2523 = vst [vmem:[#allocation2 + $0xa0] sm:$0xff] %v2447_v6  }
 0x122   : > { %v709_v9 = vpop.f32.mrf.mxu0  ;;  %v837_v10 = vpop.f32.mrf.mxu1 }
 0x124   : > { %v2722_v11 = vpop.f32.mrf.mxu0  ;;  %v2754_v13 = vpop.f32.mrf.mxu1 }
 0x125   : > { %v2382_v12 = vpack.c.bf16 %v2722_v11, %v2721_v7  ;;  %v2462_v14 = vpack.c.bf16 %v2754_v13, %v2753_v8 }
 0x126   : > { %v712_v15 = vpop.f32.mrf.mxu0  ;;  %v840_v17 = vpop.f32.mrf.mxu1 }
 0x127   : > { %2510 = vst [vmem:[#allocation2 + $0x38] sm:$0xff] %v2382_v12   ;;  %v2377_v16 = vpack.c.bf16 %v712_v15, %v709_v9  ;;  %2526 = vst [vmem:[#allocation2 + $0xb8] sm:$0xff] %v2462_v14   ;;  %v2457_v18 = vpack.c.bf16 %v840_v17, %v837_v10 }
 0x128   : > { %v2725_v19 = vpop.f32.mrf.mxu0  ;;  %v2757_v20 = vpop.f32.mrf.mxu1 }
 0x129   : > { %2509 = vst [vmem:[#allocation2 + $0x30] sm:$0xff] %v2377_v16   ;;  %2525 = vst [vmem:[#allocation2 + $0xb0] sm:$0xff] %v2457_v18  }
 0x12a   : > { %v725_v21 = vpop.f32.mrf.mxu0  ;;  %v853_v22 = vpop.f32.mrf.mxu1 }
 0x12c   : > { %v2726_v23 = vpop.f32.mrf.mxu0  ;;  %v2758_v25 = vpop.f32.mrf.mxu1 }
 0x12d   : > { %v2392_v24 = vpack.c.bf16 %v2726_v23, %v2725_v19  ;;  %v2472_v26 = vpack.c.bf16 %v2758_v25, %v2757_v20 }
 0x12e   : > { %v728_v27 = vpop.f32.mrf.mxu0  ;;  %v856_v29 = vpop.f32.mrf.mxu1 }
 0x12f   : > { %2512 = vst [vmem:[#allocation2 + $0x48] sm:$0xff] %v2392_v24   ;;  %v2387_v28 = vpack.c.bf16 %v728_v27, %v725_v21  ;;  %2528 = vst [vmem:[#allocation2 + $0xc8] sm:$0xff] %v2472_v26   ;;  %v2467_v30 = vpack.c.bf16 %v856_v29, %v853_v22 }
 0x130   : > { %v2729_v31 = vpop.f32.mrf.mxu0  ;;  %v2761_v32 = vpop.f32.mrf.mxu1 }
 0x131   : > { %2511 = vst [vmem:[#allocation2 + $0x40] sm:$0xff] %v2387_v28   ;;  %2527 = vst [vmem:[#allocation2 + $0xc0] sm:$0xff] %v2467_v30  }
 0x132   : > { %v741_v33 = vpop.f32.mrf.mxu0  ;;  %v869_v34 = vpop.f32.mrf.mxu1 }
 0x134   : > { %v2730_v35 = vpop.f32.mrf.mxu0  ;;  %v2762_v37 = vpop.f32.mrf.mxu1 }
 0x135   : > { %v2402_v36 = vpack.c.bf16 %v2730_v35, %v2729_v31  ;;  %v2482_v38 = vpack.c.bf16 %v2762_v37, %v2761_v32 }
 0x136   : > { %v744_v39 = vpop.f32.mrf.mxu0  ;;  %v872_v41 = vpop.f32.mrf.mxu1 }
 0x137   : > { %2514 = vst [vmem:[#allocation2 + $0x58] sm:$0xff] %v2402_v36   ;;  %v2397_v40 = vpack.c.bf16 %v744_v39, %v741_v33  ;;  %2530 = vst [vmem:[#allocation2 + $0xd8] sm:$0xff] %v2482_v38   ;;  %v2477_v42 = vpack.c.bf16 %v872_v41, %v869_v34 }
 0x138   : > { %v2733_v43 = vpop.f32.mrf.mxu0  ;;  %v2765_v44 = vpop.f32.mrf.mxu1 }
 0x139   : > { %2513 = vst [vmem:[#allocation2 + $0x50] sm:$0xff] %v2397_v40   ;;  %2529 = vst [vmem:[#allocation2 + $0xd0] sm:$0xff] %v2477_v42  }
 0x13a   : > { %v757_v45 = vpop.f32.mrf.mxu0  ;;  %v885_v46 = vpop.f32.mrf.mxu1 }
 0x13c   : > { %v2734_v47 = vpop.f32.mrf.mxu0  ;;  %v2766_v49 = vpop.f32.mrf.mxu1 }
 0x13d   : > { %v2412_v48 = vpack.c.bf16 %v2734_v47, %v2733_v43  ;;  %v2492_v50 = vpack.c.bf16 %v2766_v49, %v2765_v44 }
 0x13e   : > { %v760_v51 = vpop.f32.mrf.mxu0  ;;  %v888_v53 = vpop.f32.mrf.mxu1 }
 0x13f   : > { %2516 = vst [vmem:[#allocation2 + $0x68] sm:$0xff] %v2412_v48   ;;  %v2407_v52 = vpack.c.bf16 %v760_v51, %v757_v45  ;;  %2532 = vst [vmem:[#allocation2 + $0xe8] sm:$0xff] %v2492_v50   ;;  %v2487_v54 = vpack.c.bf16 %v888_v53, %v885_v46 }
 0x140   : > { %v2737_v55 = vpop.f32.mrf.mxu0  ;;  %v2769_v56 = vpop.f32.mrf.mxu1 }
 0x141   : > { %2515 = vst [vmem:[#allocation2 + $0x60] sm:$0xff] %v2407_v52   ;;  %2531 = vst [vmem:[#allocation2 + $0xe0] sm:$0xff] %v2487_v54  }
 0x142   : > { %v773_v57 = vpop.f32.mrf.mxu0  ;;  %v901_v58 = vpop.f32.mrf.mxu1 }
 0x144   : > { %v2738_v59 = vpop.f32.mrf.mxu0  ;;  %v2770_v61 = vpop.f32.mrf.mxu1 }
 0x145   : > { %v2422_v60 = vpack.c.bf16 %v2738_v59, %v2737_v55  ;;  %v2502_v62 = vpack.c.bf16 %v2770_v61, %v2769_v56 }
 0x146   : > { %v776_v63 = vpop.f32.mrf.mxu0  ;;  %v904_v1 = vpop.f32.mrf.mxu1 }
 0x147   : > { %2518 = vst [vmem:[#allocation2 + $0x78] sm:$0xff] %v2422_v60   ;;  %v2417_v0 = vpack.c.bf16 %v776_v63, %v773_v57  ;;  %2534 = vst [vmem:[#allocation2 + $0xf8] sm:$0xff] %v2502_v62   ;;  %v2497_v2 = vpack.c.bf16 %v904_v1, %v901_v58 }
 0x149   : > { %2517 = vst [vmem:[#allocation2 + $0x70] sm:$0xff] %v2417_v0   ;;  %2533 = vst [vmem:[#allocation2 + $0xf0] sm:$0xff] %v2497_v2  }
 0x14a PF: > { %v2936_v5 = vld [vmem:[#allocation2 + $0x38] sm:$0xff]   ;;  %v2940_v9 = vld [vmem:[#allocation2 + $0x30] sm:$0xff]   ;;  %v2942_v11 = vld [vmem:[#allocation2 + $0x68] sm:$0xff]   ;;  %vm3169_vm2 = vmmov 0   ;;  %s1967_s10 = sshll.u32 %s3341_s11, 4  ;;  %s3592_s10 = int_to_ptr.vmem [resolvable:$true] %s1967_s10 }
 0x14b   : > { %v2937_v6 = vld [vmem:[#allocation2 + $0xb8] sm:$0xff]   ;;  %v2941_v10 = vld [vmem:[#allocation2 + $0xb0] sm:$0xff]   ;;  %v2943_v12 = vld [vmem:[#allocation2 + $0xe8] sm:$0xff]   ;;  %s3042_s12 = scalar_lea.vmem %s3592_s10, 128 }
 0x14c   : > { %v2944_v13 = vld [vmem:[#allocation2 + $0x28] sm:$0xff]   ;;  %v2946_v15 = vld [vmem:[#allocation2 + $0x60] sm:$0xff]   ;;  %v2950_v19 = vld [vmem:[#allocation2 + $0x58] sm:$0xff]   ;;  %p3043_p6 = scmp.ne.s32.totalorder %s3592_s10, %s3042_s12 }
 0x14d   : > { %v2945_v14 = vld [vmem:[#allocation2 + $0xa8] sm:$0xff]   ;;  %v2947_v16 = vld [vmem:[#allocation2 + $0xe0] sm:$0xff]   ;;  %v2951_v20 = vld [vmem:[#allocation2 + $0xd8] sm:$0xff]  }
 0x14e   : > { %v2934_v3 = vld [vmem:[#allocation2 + $0x78] sm:$0xff]   ;;  %v2948_v17 = vld [vmem:[#allocation2 + $0x20] sm:$0xff]   ;;  %v2954_v23 = vld [vmem:[#allocation2 + $0x50] sm:$0xff]   ;;  %p3044_p8 = pnand %p3043_p6, %p3294_p12 }
 0x14f   : > { %v2935_v4 = vld [vmem:[#allocation2 + $0xf8] sm:$0xff]   ;;  %2568 = vmatprep.subr.bf16.mxu0 %v2934_v3  ;;  %v2949_v18 = vld [vmem:[#allocation2 + $0xa0] sm:$0xff]   ;;  %v2955_v24 = vld [vmem:[#allocation2 + $0xd0] sm:$0xff]   ;;  %v3168_v3 = vmov 0.0  }
 0x150   : > { %2632 = vmatprep.subr.bf16.mxu1 %v2935_v4  ;;  %2569 = vmatpush3.bf16.msra.mxu0 %v2936_v5  ;;  %v2938_v7 = vld [vmem:[#allocation2 + $0x70] sm:$0xff]   ;;  %v2952_v21 = vld [vmem:[#allocation2 + $0x18] sm:$0xff]   ;;  %v2958_v27 = vld [vmem:[#allocation2 + $0x48] sm:$0xff]   ;;  %p3045_p9 = pneg %p3044_p8 }
 0x151   : > { %2633 = vmatpush3.bf16.msra.mxu1 %v2937_v6  ;;  %v2939_v8 = vld [vmem:[#allocation2 + $0xf0] sm:$0xff]   ;;  %2570 = vmatprep.subr.bf16.mxu0 %v2938_v7  ;;  %v2953_v22 = vld [vmem:[#allocation2 + $0x98] sm:$0xff]   ;;  %v2959_v28 = vld [vmem:[#allocation2 + $0xc8] sm:$0xff]  }
 0x152   : > { %2634 = vmatprep.subr.bf16.mxu1 %v2939_v8  ;;  %v2956_v25 = vld [vmem:[#allocation2 + $0x10] sm:$0xff]   ;;  %v2960_v29 = vld [vmem:[#allocation2 + $0x8] sm:$0xff]   ;;  %v2962_v31 = vld [vmem:[#allocation2 + $0x40] sm:$0xff]  }
 0x153   : > { %v2957_v26 = vld [vmem:[#allocation2 + $0x90] sm:$0xff]   ;;  %v2961_v30 = vld [vmem:[#allocation2 + $0x88] sm:$0xff]   ;;  %v2963_v32 = vld [vmem:[#allocation2 + $0xc0] sm:$0xff]  }
 0x154   : > { %2571 = vmatpush3.bf16.msra.mxu0 %v2940_v9  ;;  %v2964_v33 = vld [vmem:[#allocation2] sm:$0xff]   ;;  %v2969_v37 = vld [vmem:[%s3325_s8 + $0x8] ss:$16 sps:$4 sm:$0xff]   ;;  %v2971_v38 = vld [vmem:[%s3325_s8 + $0xc] ss:$16 sps:$4 sm:$0xff]  }
 0x155   : > { %2635 = vmatpush3.bf16.msra.mxu1 %v2941_v10  ;;  %2572 = vmatprep.subr.bf16.mxu0 %v2942_v11  ;;  %v2965_v34 = vld [vmem:[#allocation2 + $0x80] sm:$0xff]   ;;  %v2974_v40 = vld [vmem:[%s3325_s8 + $0x2c] ss:$16 sps:$4 sm:$0xff]   ;;  %v2977_v42 = vld [vmem:[%s3325_s8 + $0x28] ss:$16 sps:$4 sm:$0xff]  }
 0x156   : > { %2636 = vmatprep.subr.bf16.mxu1 %v2943_v12  ;;  %v2966_v35 = vld [vmem:[%s3325_s8] ss:$16 sps:$4 sm:$0xff]   ;;  %v2968_v36 = vld [vmem:[%s3325_s8 + $0x4] ss:$16 sps:$4 sm:$0xff]   ;;  %1819 = vmatprep.mubr.bf16.mxu1 %v2971_v38  ;;  %v2980_v44 = vld [vmem:[%s3325_s8 + $0x4c] ss:$16 sps:$4 sm:$0xff]  }
 0x157   : > { %1722 = vmatprep.mubr.bf16.mxu0 %v2968_v36  ;;  %v2972_v39 = vld [vmem:[%s3325_s8 + $0x24] ss:$16 sps:$4 sm:$0xff]   ;;  %v2976_v41 = vld [vmem:[%s3325_s8 + $0x20] ss:$16 sps:$4 sm:$0xff]   ;;  %v2983_v46 = vld [vmem:[%s3325_s8 + $0x48] ss:$16 sps:$4 sm:$0xff]  }
 0x158   : > { %2573 = vmatpush3.bf16.msra.mxu0 %v2944_v13  ;;  %v2978_v43 = vld [vmem:[%s3325_s8 + $0x44] ss:$16 sps:$4 sm:$0xff]   ;;  %v2982_v45 = vld [vmem:[%s3325_s8 + $0x40] ss:$16 sps:$4 sm:$0xff]   ;;  %v2986_v48 = vld [vmem:[%s3325_s8 + $0x6c] ss:$16 sps:$4 sm:$0xff]  }
 0x159   : > { %2637 = vmatpush3.bf16.msra.mxu1 %v2945_v14  ;;  %2574 = vmatprep.subr.bf16.mxu0 %v2946_v15  ;;  %v2984_v47 = vld [vmem:[%s3325_s8 + $0x64] ss:$16 sps:$4 sm:$0xff]   ;;  %v2988_v49 = vld [vmem:[%s3325_s8 + $0x60] ss:$16 sps:$4 sm:$0xff]   ;;  %v2989_v50 = vld [vmem:[%s3325_s8 + $0x68] ss:$16 sps:$4 sm:$0xff]  }
 0x15a   : > { %2638 = vmatprep.subr.bf16.mxu1 %v2947_v16  ;;  %v2990_v51 = vld [vmem:[%s3325_s8 + $0x84] ss:$16 sps:$4 sm:$0xff]   ;;  %v2992_v52 = vld [vmem:[%s3325_s8 + $0x8c] ss:$16 sps:$4 sm:$0xff]   ;;  %v2994_v53 = vld [vmem:[%s3325_s8 + $0x80] ss:$16 sps:$4 sm:$0xff]  }
 0x15b   : > { %v2995_v54 = vld [vmem:[%s3325_s8 + $0x88] ss:$16 sps:$4 sm:$0xff]   ;;  %v2996_v55 = vld [vmem:[%s3325_s8 + $0xa4] ss:$16 sps:$4 sm:$0xff]   ;;  %v2998_v56 = vld [vmem:[%s3325_s8 + $0xac] ss:$16 sps:$4 sm:$0xff]  }
 0x15c   : > { %2575 = vmatpush3.bf16.msra.mxu0 %v2948_v17  ;;  %v3000_v57 = vld [vmem:[%s3325_s8 + $0xa0] ss:$16 sps:$4 sm:$0xff]   ;;  %v3001_v58 = vld [vmem:[%s3325_s8 + $0xa8] ss:$16 sps:$4 sm:$0xff]   ;;  %v3002_v59 = vld [vmem:[%s3325_s8 + $0xc4] ss:$16 sps:$4 sm:$0xff]  }
 0x15d   : > { %2639 = vmatpush3.bf16.msra.mxu1 %v2949_v18  ;;  %2576 = vmatprep.subr.bf16.mxu0 %v2950_v19  ;;  %v3004_v60 = vld [vmem:[%s3325_s8 + $0xcc] ss:$16 sps:$4 sm:$0xff]   ;;  %v3006_v61 = vld [vmem:[%s3325_s8 + $0xc0] ss:$16 sps:$4 sm:$0xff]   ;;  %v3007_v62 = vld [vmem:[%s3325_s8 + $0xc8] ss:$16 sps:$4 sm:$0xff]  }
 0x15e   : > { %2640 = vmatprep.subr.bf16.mxu1 %v2951_v20  ;;  %v3008_v63 = vld [vmem:[%s3325_s8 + $0xe4] ss:$16 sps:$4 sm:$0xff]   ;;  %v3010_v0 = vld [vmem:[%s3325_s8 + $0xec] ss:$16 sps:$4 sm:$0xff]   ;;  %v3012_v1 = vld [vmem:[%s3325_s8 + $0xe0] ss:$16 sps:$4 sm:$0xff]  }
 0x15f   : > { %v3013_v2 = vld [vmem:[%s3325_s8 + $0xe8] ss:$16 sps:$4 sm:$0xff]   ;;  %v3513_v6 = vld [vmem:[%s3658_s4] ss:$0 sm:$0xff]  ;;  %s2275_s8 = sshll.u32 %s3150_s25, 7  ;;  %s3170_s25 = smov [#allocation6]  }
 0x160   : > { %2577 = vmatpush3.bf16.msra.mxu0 %v2952_v21  ;;  %s3590_s9 = scalar_lea.hbm %s3659_s5, %s2275_s8  ;;  %s3046_s7 = sshll.u32 %s3170_s25, 4  ;;  %s3047_s7 = int_to_ptr.vmem [resolvable:$false] %s3046_s7 }
 0x161   : > { %2641 = vmatpush3.bf16.msra.mxu1 %v2953_v22  ;;  %2578 = vmatprep.subr.bf16.mxu0 %v2954_v23  ;;  %s3048_s15 = scalar_lea.vmem %s3047_s7, 256  ;;  %p3049_p10 = scmp.lt.s32.totalorder %s3592_s10, %s3047_s7 }
 0x162   : > { %2642 = vmatprep.subr.bf16.mxu1 %v2955_v24  ;;  %p3050_p11 = scmp.lt.s32.totalorder %s3048_s15, %s3042_s12 }
 0x164   : > { %2579 = vmatpush3.bf16.msra.mxu0 %v2956_v25  ;;  %p3051_p13 = por %p3050_p11, %p3049_p10 }
 0x165   : > { %2643 = vmatpush3.bf16.msra.mxu1 %v2957_v26  ;;  %2580 = vmatprep.subr.bf16.mxu0 %v2958_v27 }
 0x166   : > { %2644 = vmatprep.subr.bf16.mxu1 %v2959_v28  ;;  %p3052_p5 = pnand %p3051_p13, %p3045_p9 }
 0x168   : > { %2581 = vmatpush3.bf16.msra.mxu0 %v2960_v29 }
 0x169   : > { %2645 = vmatpush3.bf16.msra.mxu1 %v2961_v30  ;;  %2582 = vmatprep.subr.bf16.mxu0 %v2962_v31 }
 0x16a   : > { %2646 = vmatprep.subr.bf16.mxu1 %v2963_v32 }
 0x16c   : > { %2583 = vmatpush3.bf16.msra.mxu0 %v2964_v33 }
 0x16d   : > { %2647 = vmatpush3.bf16.msra.mxu1 %v2965_v34  ;;  %2771 = vmatprep.subr.bf16.mxu0 %v3168_v3 }
 0x16f   : > { %1723 = vmatmul.mubr.bf16.vlgmr.msra.gmra.mxu0 %v2966_v35 }
 0x170   : > { %1820 = vmatmul.mubr.bf16.vlgmr.msra.gmra.mxu1 %v2969_v37  ;;  %1730 = vmatprep.mubr.bf16.mxu0 %v2972_v39 }
 0x171   : > { %1827 = vmatprep.mubr.bf16.mxu1 %v2974_v40 }
 0x177   : > { %1731 = vmatmul.mubr.bf16.gmra.mxu0 %v2976_v41 }
 0x178   : > { %1828 = vmatmul.mubr.bf16.gmra.mxu1 %v2977_v42  ;;  %1738 = vmatprep.mubr.bf16.mxu0 %v2978_v43 }
 0x179   : > { %1835 = vmatprep.mubr.bf16.mxu1 %v2980_v44 }
 0x17f   : > { %1739 = vmatmul.mubr.bf16.gmra.mxu0 %v2982_v45 }
 0x180   : > { %1836 = vmatmul.mubr.bf16.gmra.mxu1 %v2983_v46  ;;  %1746 = vmatprep.mubr.bf16.mxu0 %v2984_v47 }
 0x181   : > { %1843 = vmatprep.mubr.bf16.mxu1 %v2986_v48 }
 0x187   : > { %1747 = vmatmul.mubr.bf16.gmra.mxu0 %v2988_v49 }
 0x188   : > { %1844 = vmatmul.mubr.bf16.gmra.mxu1 %v2989_v50  ;;  %1754 = vmatprep.mubr.bf16.mxu0 %v2990_v51 }
 0x189   : > { %1851 = vmatprep.mubr.bf16.mxu1 %v2992_v52 }
 0x18f   : > { %1755 = vmatmul.mubr.bf16.gmra.mxu0 %v2994_v53 }
 0x190   : > { %1852 = vmatmul.mubr.bf16.gmra.mxu1 %v2995_v54  ;;  %1762 = vmatprep.mubr.bf16.mxu0 %v2996_v55 }
 0x191   : > { %1859 = vmatprep.mubr.bf16.mxu1 %v2998_v56 }
 0x197   : > { %1763 = vmatmul.mubr.bf16.gmra.mxu0 %v3000_v57 }
 0x198   : > { %1860 = vmatmul.mubr.bf16.gmra.mxu1 %v3001_v58  ;;  %1770 = vmatprep.mubr.bf16.mxu0 %v3002_v59 }
 0x199   : > { %1867 = vmatprep.mubr.bf16.mxu1 %v3004_v60 }
 0x19f   : > { %1771 = vmatmul.mubr.bf16.gmra.mxu0 %v3006_v61 }
 0x1a0   : > { %1868 = vmatmul.mubr.bf16.gmra.mxu1 %v3007_v62  ;;  %1778 = vmatprep.mubr.bf16.mxu0 %v3008_v63 }
 0x1a1   : > { %1875 = vmatprep.mubr.bf16.mxu1 %v3010_v0 }
 0x1a7   : > { %1779 = vmatmul.mubr.bf16.gmra.mxu0 %v3012_v1 }
 0x1a8   : > { %1876 = vmatmul.mubr.bf16.gmra.mxu1 %v3013_v2  ;;  %2787 = vmatprep.mubr.msk.bf16.mxu0 %vm3169_vm2, %v3168_v3 }
 0x22f   : > { %v2584_v4 = vpop.f32.mrf.mxu0 }
 0x230   : > { %v2648_v5 = vpop.f32.mrf.mxu1 }
 0x231   : > { %v2585_v7 = vpop.f32.mrf.mxu0 }
 0x232   : > { %v2586_v8 = vadd.f32 %v2585_v7, %v2584_v4  ;;  %v2649_v9 = vpop.f32.mrf.mxu1 }
 0x233   : > { %v2650_v10 = vadd.f32 %v2649_v9, %v2648_v5  ;;  %v2587_v11 = vpop.f32.mrf.mxu0 }
 0x234   : > { %v1725_v12 = vadd.f32 %v2586_v8, %v3513_v6  ;;  %v2651_v13 = vpop.f32.mrf.mxu1 }
 0x235   : > { %v2588_v14 = vpop.f32.mrf.mxu0 }
 0x236   : > { %v1822_v15 = vadd.f32 %v2650_v10, %v1725_v12  ;;  %v2589_v16 = vadd.f32 %v2588_v14, %v2587_v11  ;;  %v2652_v17 = vpop.f32.mrf.mxu1 }
 0x237   : > { %v2653_v18 = vadd.f32 %v2652_v17, %v2651_v13  ;;  %v2590_v19 = vpop.f32.mrf.mxu0 }
 0x238   : > { %v1728_v20 = vadd.f32 %v2589_v16, %v3513_v6  ;;  %v2654_v21 = vpop.f32.mrf.mxu1  ;;  %v1884_v28 = vmax.f32 %v1822_v15, 0.0 }
 0x239   : > { %v2591_v22 = vpop.f32.mrf.mxu0 }
 0x23a   : > { %v1825_v23 = vadd.f32 %v2653_v18, %v1728_v20  ;;  %v2592_v24 = vadd.f32 %v2591_v22, %v2590_v19  ;;  %v2655_v25 = vpop.f32.mrf.mxu1 }
 0x23b   : > { %v2656_v26 = vadd.f32 %v2655_v25, %v2654_v21  ;;  %v2593_v27 = vpop.f32.mrf.mxu0 }
 0x23c   : > { %v1885_v29 = vmax.f32 %v1825_v23, 0.0  ;;  %v1733_v30 = vadd.f32 %v2592_v24, %v3513_v6  ;;  %v2657_v31 = vpop.f32.mrf.mxu1 }
 0x23d   : > { %v2594_v32 = vpop.f32.mrf.mxu0 }
 0x23e   : > { %v3518_v33 = vpack.c.bf16 %v1885_v29, %v1884_v28  ;;  %v1830_v34 = vadd.f32 %v2656_v26, %v1733_v30  ;;  %v2595_v35 = vadd.f32 %v2594_v32, %v2593_v27  ;;  %v2658_v36 = vpop.f32.mrf.mxu1 }
 0x23f   : > { %v2659_v37 = vadd.f32 %v2658_v36, %v2657_v31  ;;  %v2596_v38 = vpop.f32.mrf.mxu0 }
 0x240   : > { %v1736_v39 = vadd.f32 %v2595_v35, %v3513_v6  ;;  %v2660_v40 = vpop.f32.mrf.mxu1  ;;  %v1886_v47 = vmax.f32 %v1830_v34, 0.0 }
 0x241   : > { %v2597_v41 = vpop.f32.mrf.mxu0 }
 0x242   : > { %v1833_v42 = vadd.f32 %v2659_v37, %v1736_v39  ;;  %v2598_v43 = vadd.f32 %v2597_v41, %v2596_v38  ;;  %v2661_v44 = vpop.f32.mrf.mxu1 }
 0x243   : > { %v2662_v45 = vadd.f32 %v2661_v44, %v2660_v40  ;;  %v3521_v46 = vpop.f32.mrf.mxu0 }
 0x244   : > { %v1887_v48 = vmax.f32 %v1833_v42, 0.0  ;;  %v1741_v49 = vadd.f32 %v2598_v43, %v3513_v6  ;;  %v3524_v50 = vpop.f32.mrf.mxu1 }
 0x245   : > { %v3526_v51 = vpop.f32.mrf.mxu0 }
 0x246   : > { %v3528_v52 = vpack.c.bf16 %v1887_v48, %v1886_v47  ;;  %v3530_v53 = vadd.f32 %v2662_v45, %v1741_v49  ;;  %v3532_v54 = vpop.f32.mrf.mxu1 }
 0x247   : > { %v3534_v55 = vpop.f32.mrf.mxu0 }
 0x248   : > { %v3536_v56 = vpop.f32.mrf.mxu1 }
 0x249   : > { %v3538_v57 = vpop.f32.mrf.mxu0 }
 0x24a   : > { %v3540_v58 = vpop.f32.mrf.mxu1 }
 0x24b   : > { %v2605_v59 = vpop.f32.mrf.mxu0 }
 0x24c   : > { %v3542_v60 = vpop.f32.mrf.mxu1 }
 0x24d   : > { %v2606_v61 = vpop.f32.mrf.mxu0 }
 0x24e   : > { %v3544_v62 = vpop.f32.mrf.mxu1 }
 0x24f   : > { %v2608_v63 = vpop.f32.mrf.mxu0 }
 0x250   : > { %v3546_v0 = vpop.f32.mrf.mxu1 }
 0x251   : > { %v2609_v1 = vpop.f32.mrf.mxu0 }
 0x252   : > { %v3548_v2 = vpop.f32.mrf.mxu1 }
 0x253   : > { %v2611_v4 = vpop.f32.mrf.mxu0 }
 0x254   : > { %v2675_v5 = vpop.f32.mrf.mxu1 }
 0x255   : > { %v2612_v7 = vpop.f32.mrf.mxu0 }
 0x256   : > { %v2676_v8 = vpop.f32.mrf.mxu1  ;;  %v2613_v49 = vadd.f32 %v2612_v7, %v2611_v4  ;;  %v2604_v4 = vadd.f32 %v3538_v57, %v3534_v55  ;;  %v2671_v57 = vadd.f32 %v3544_v62, %v3542_v60 }
 0x257   : > { %v2614_v9 = vpop.f32.mrf.mxu0 }
 0x258   : > { %v2678_v10 = vpop.f32.mrf.mxu1  ;;  %v1749_v55 = vadd.f32 %v2604_v4, %v3513_v6 }
 0x259   : > { %v2615_v11 = vpop.f32.mrf.mxu0 }
 0x25a   : > { %v2679_v12 = vpop.f32.mrf.mxu1  ;;  %v2616_v42 = vadd.f32 %v2615_v11, %v2614_v9  ;;  %v2607_v11 = vadd.f32 %v2606_v61, %v2605_v59  ;;  %v2674_v61 = vadd.f32 %v3548_v2, %v3546_v0 }
 0x25b   : > { %v2617_v13 = vpop.f32.mrf.mxu0 }
 0x25c   : > { %v2681_v14 = vpop.f32.mrf.mxu1  ;;  %v1752_v59 = vadd.f32 %v2607_v11, %v3513_v6 }
 0x25d   : > { %v2618_v15 = vpop.f32.mrf.mxu0 }
 0x25e   : > { %v2682_v16 = vpop.f32.mrf.mxu1  ;;  %v2619_v37 = vadd.f32 %v2618_v15, %v2617_v13  ;;  %v2610_v13 = vadd.f32 %v2609_v1, %v2608_v63  ;;  %v1765_v15 = vadd.f32 %v2616_v42, %v3513_v6 }
 0x25f   : > { %v2620_v17 = vpop.f32.mrf.mxu0 }
 0x260   : > { %v2684_v18 = vpop.f32.mrf.mxu1  ;;  %v1757_v7 = vadd.f32 %v2610_v13, %v3513_v6 }
 0x261   : > { %v2621_v19 = vpop.f32.mrf.mxu0 }
 0x262   : > { %v2685_v20 = vpop.f32.mrf.mxu1  ;;  %v2622_v31 = vadd.f32 %v2621_v19, %v2620_v17  ;;  %v1768_v17 = vadd.f32 %v2619_v37, %v3513_v6 }
 0x263   : > { %v2623_v21 = vpop.f32.mrf.mxu0  ;;  %v2686_v19 = vadd.f32 %v2685_v20, %v2684_v18  ;;  %v2677_v18 = vadd.f32 %v2676_v8, %v2675_v5  ;;  %v1854_v5 = vadd.f32 %v2674_v61, %v1757_v7  ;;  %v1849_v20 = vadd.f32 %v2671_v57, %v1752_v59 }
 0x264   : > { %v2687_v22 = vpop.f32.mrf.mxu1  ;;  %v1773_v43 = vadd.f32 %v2622_v31, %v3513_v6  ;;  %v2665_v31 = vadd.f32 %v3532_v54, %v3524_v50  ;;  %v1888_v50 = vmax.f32 %v3530_v53, 0.0  ;;  %v1900_v53 = vld [vmem:[%s3341_s11] sm:$0xff] }
 0x265   : > { %v2624_v23 = vpop.f32.mrf.mxu0  ;;  %v1891_v62 = vmax.f32 %v1849_v20, 0.0 }
 0x266   : > { %v2688_v24 = vpop.f32.mrf.mxu1  ;;  %v2625_v28 = vadd.f32 %v2624_v23, %v2623_v21 }
 0x267   : > { %v2626_v25 = vpop.f32.mrf.mxu0  ;;  %v2689_v44 = vadd.f32 %v2688_v24, %v2687_v22  ;;  %v1760_v22 = vadd.f32 %v2613_v49, %v3513_v6  ;;  %v2680_v24 = vadd.f32 %v2679_v12, %v2678_v10 }
 0x268   : > { %v2690_v26 = vpop.f32.mrf.mxu1  ;;  %v1776_v38 = vadd.f32 %v2625_v28, %v3513_v6 }
 0x269   : > { %v2627_v27 = vpop.f32.mrf.mxu0  ;;  %v1862_v63 = vadd.f32 %v2680_v24, %v1765_v15  ;;  %v1857_v10 = vadd.f32 %v2677_v18, %v1760_v22 }
 0x26a   : > { %v2628_v29 = vadd.f32 %v2627_v27, %v2626_v25  ;;  %v2691_v30 = vpop.f32.mrf.mxu1  ;;  %v1873_v21 = vadd.f32 %v2689_v44, %v1776_v38  ;;  %v2683_v25 = vadd.f32 %v2682_v16, %v2681_v14  ;;  %v2601_v14 = vadd.f32 %v3526_v51, %v3521_v46 }
 0x26b   : > { %v2629_v32 = vpop.f32.mrf.mxu0  ;;  %v2692_v39 = vadd.f32 %v2691_v30, %v2690_v26  ;;  %v1870_v26 = vadd.f32 %v2686_v19, %v1773_v43  ;;  %v1894_v8 = vmax.f32 %v1862_v63, 0.0  ;;  %v2668_v51 = vadd.f32 %v3540_v58, %v3536_v56 }
 0x26c   : > { %v1781_v34 = vadd.f32 %v2628_v29, %v3513_v6  ;;  %v2693_v35 = vpop.f32.mrf.mxu1  ;;  %v1865_v28 = vadd.f32 %v2683_v25, %v1768_v17  ;;  %v1897_v29 = vmax.f32 %v1873_v21, 0.0  ;;  %v1744_v46 = vadd.f32 %v2601_v14, %v3513_v6 }
 0x26d   : > { %v2630_v36 = vpop.f32.mrf.mxu0  ;;  %v1896_v1 = vmax.f32 %v1870_v26, 0.0  ;;  %v1893_v0 = vmax.f32 %v1857_v10, 0.0 }
 0x26e   : > { %v2631_v40 = vadd.f32 %v2630_v36, %v2629_v32  ;;  %v2694_v41 = vpop.f32.mrf.mxu1  ;;  %v1878_v45 = vadd.f32 %v2692_v39, %v1781_v34  ;;  %v1895_v12 = vmax.f32 %v1865_v28, 0.0  ;;  %v1846_v32 = vadd.f32 %v2668_v51, %v1749_v55  ;;  %v1901_v36 = vld [vmem:[%s3339_s16] sm:$0xff]  ;;  %s1954_s16 = scalar_lea.sflag [#allocation5], %s282_s27 }
 0x26f   : > { %v2695_v48 = vadd.f32 %v2694_v41, %v2693_v35  ;;  %v1909_v16 = vpack.c.bf16 %v1897_v29, %v1896_v1  ;;  %v1892_v34 = vmax.f32 %v1854_v5, 0.0  ;;  %v1841_v60 = vadd.f32 %v2665_v31, %v1744_v46 }
 0x270   : > { %v1784_v47 = vadd.f32 %v2631_v40, %v3513_v6  ;;  %v1898_v27 = vmax.f32 %v1878_v45, 0.0  ;;  %v1908_v2 = vpack.c.bf16 %v1895_v12, %v1894_v8  ;;  %v1890_v35 = vmax.f32 %v1846_v32, 0.0 }
 0x271   : > { %v1907_v6 = vpack.c.bf16 %v1893_v0, %v1892_v34  ;;  %v1889_v56 = vmax.f32 %v1841_v60, 0.0  ;;  %v1902_v37 = vpack.c.bf16 %v1901_v36, %v1901_v36 }
 0x272   : > { %v1881_v23 = vadd.f32 %v2695_v48, %v1784_v47  ;;  %v1906_v58 = vpack.c.bf16 %v1891_v62, %v1890_v35 }
 0x273   : > { %v1905_v54 = vpack.c.bf16 %v1889_v56, %v1888_v50 }
 0x274   : > { %v1899_v9 = vmax.f32 %v1881_v23, 0.0 }
 0x276   : > { %v1910_v30 = vpack.c.bf16 %v1899_v9, %v1898_v27 }
 0x278   : > { %2772 = vmatpush3.bf16.msra.mxu0 %v1910_v30 }
 0x279   : > { %2773 = vmatprep.subr.bf16.mxu0 %v3168_v3 }
 0x27c   : > { %2774 = vmatpush3.bf16.msra.mxu0 %v1909_v16 }
 0x27d   : > { %2775 = vmatprep.subr.bf16.mxu0 %v3168_v3 }
 0x280   : > { %2776 = vmatpush3.bf16.msra.mxu0 %v1908_v2 }
 0x281   : > { %2777 = vmatprep.subr.bf16.mxu0 %v3168_v3 }
 0x284   : > { %2778 = vmatpush3.bf16.msra.mxu0 %v1907_v6 }
 0x285   : > { %2779 = vmatprep.subr.bf16.mxu0 %v3168_v3 }
 0x288   : > { %2780 = vmatpush3.bf16.msra.mxu0 %v1906_v58 }
 0x289   : > { %2781 = vmatprep.subr.bf16.mxu0 %v3168_v3 }
 0x28c   : > { %2782 = vmatpush3.bf16.msra.mxu0 %v1905_v54 }
 0x28d   : > { %2783 = vmatprep.subr.bf16.mxu0 %v3168_v3 }
 0x290   : > { %2784 = vmatpush3.bf16.msra.mxu0 %v3528_v52 }
 0x291   : > { %2785 = vmatprep.subr.bf16.mxu0 %v3168_v3 }
 0x294   : > { %2786 = vmatpush3.bf16.msra.mxu0 %v3518_v33 }
 0x297   : > { %2788 = vmatmul.mubr.bf16.vlgmr.msra.gmra.mxu0 %v1902_v37 }
 0x357   : > { %v1945_v38 = vpop.f32.mrf.mxu0 }
 0x358   : > { %v1951_v39 = vadd.f32 %v1945_v38, %v1900_v53 }
 0x359   : > { %v2789_v3 = vpop.f32.mrf.mxu0 }
 0x35a   : > { %1952 = vst [vmem:[%s3341_s11] sm:$0xff] %v1951_v39 }
 0x35b   : > { %v1948_v52 = vpop.f32.mrf.mxu0 }
 0x35c   : > { %3055 = shalt.err (!%p3052_p5)
}
 0x35d   : > { %s3056_s11 = scalar_lea.hbm %s3590_s9, 128  ;;  %s3060_s23 = scalar_lea.hbm %s3659_s5, 256 }
 0x35e   : > { %p3057_p0 = scmp.ne.s32.totalorder %s3590_s9, %s3056_s11  ;;  %p3061_p3 = scmp.lt.s32.totalorder %s3590_s9, %s3659_s5 }
 0x35f   : > { %p3062_p7 = scmp.lt.s32.totalorder %s3060_s23, %s3056_s11 }
 0x360   : > { %p3058_p1 = pnand %p3057_p0, %p3294_p12 }
 0x361   : > { %p3063_p6 = por %p3062_p7, %p3061_p3 }
 0x362   : > { %p3059_p4 = pneg %p3058_p1 }
 0x364   : > { %p3064_p8 = pnand %p3063_p6, %p3059_p4 }
 0x366   : > { %3067 = shalt.err (!%p3064_p8)
}
 0x367   : > { %2797 = dma.vmem_to_hbm [thread:$0]  (%p3294_p12), %s3592_s10, 128, %s3590_s9, %s1954_s16   ;;  %v2790_v33 = vpop.f32.mrf.mxu0 }
 0x368 PF: > { %p2808_p9 = scmp.ge.s32.totalorder %s3162_s28, 2  ;;  %s1979_s13 = sand.u32 1, %s3122_s18  }
 0x369   : > { %s1980_s8 = scalar_lea.sflag [#allocation5], %s1979_s13 }
 0x36a   : > { %p2804_p10 = pnand %p2808_p9, %p3304_p2 }
 0x36c   : > { %p2805_p11 = pneg %p2804_p10 }
 0x36e   : > { %3117 = dma.done.wait (%p2805_p11), %s1980_s8, 128  }
 0x36f   : > { %3119 = vsyncadd (%p2805_p11), %s1980_s8, 4294967168  ;;  %s21_s28 = sadd.s32 1, %s3162_s28   ;;  %s3677_s30 = sld [smem:[#allocation9_spill]] }
 0x370   : > { %p18_p13 = scmp.ge.s32.totalorder %s21_s28, 6   ;;  %s3678_s23 = sld [smem:[#allocation14_spill]] }
 0x371   : > { %s3679_s24 = sld [smem:[#allocation10_spill]]  ;;  %s3683_s18 = smov %s3126_s19 }
 0x372   : > { %s3680_s25 = sld [smem:[#allocation11_spill]]  ;;  %s3684_s19 = smov %s3130_s20 }
 0x373   : > { %s3681_s26 = sld [smem:[#allocation12_spill]]  ;;  %s3685_s20 = smov %s3289_s21 }
 0x374   : > { %s3682_s27 = sld [smem:[#allocation13_spill]]  ;;  %s3686_s21 = smov %s3138_s22 }
 0x375   : > { %s3687_s22 = smov %s3677_s30  ;;  %20 = sbr.rel (!%p18_p13) target bundleno = 9 (0x9), region = 92 }
 0x37a   :  { %1985 = vsyncpa [#allocation4], 1 }
 0x37b   :  { %1987 = vsyncpa [#allocation4 + $0x1], 1 }
 0x37c   :  { %1988 = vsyncpa [#allocation5], 1 }
 0x37d   :  { %1990 = vsyncpa [#allocation5 + $0x1], 1 }

</bundles_post_ra>
